<compile_context>
chip_gen: v7x
topology: tpu7x:2x2x1
jax: 0.10.0
libtpu: 0.0.40
codegen_flags: <defaults>
</compile_context>

<pallas_src>
import functools

import jax
import jax.numpy as jnp
from jax.experimental import pallas as pl
from jax.experimental.pallas import tpu as pltpu

LANE = 128


def _round_up(x, m):
    return ((x + m - 1) // m) * m


def _cdiv(a, b):
    return -(-a // b)


def _vmem_capacity_bytes():
    try:
        info = pltpu.get_tpu_info()
        cap = getattr(info, "vmem_capacity_bytes", None)
        if cap:
            return int(cap)
    except Exception:
        pass
    return 64 << 20  # conservative fallback (v7x per-core VMEM)


def _fused_kernel(x_ref, h_ref, w_ref, b_ref, o_ref, ext_ref, xc_ref, *,
                  q_taps, c_in, tl, halo):
    # x_ref : (1, C_in, TL)     current input time tile (lane-dense)
    # h_ref : (1, C_in, HALO)   last HALO input samples of the previous tile
    # w_ref : (S*C_out, Q*C_in) fused transposed-conv taps
    # b_ref : (S*C_out, 1)      f32 bias, replicated per residue
    # o_ref : (1, S*C_out, TL)  lane-dense output tile (residue-major rows)
    # ext_ref: (C_in, HALO+TL)  VMEM scratch: halo ++ tile
    # xc_ref : (Q*C_in, TL)     VMEM scratch: in-kernel im2col (Q causal shifts)
    if q_taps > 1:
        t = pl.program_id(1)
        h = h_ref[0]
        # first time tile has no past: causal zero padding
        h = jnp.where(t > 0, h, jnp.zeros_like(h))
        ext_ref[:, :halo] = h
        ext_ref[:, halo:] = x_ref[0]
        for q in range(q_taps):                       # static, tiny loop
            xc_ref[q * c_in:(q + 1) * c_in, :] = ext_ref[:, pl.ds(halo - q, tl)]
        xc = xc_ref[...]
    else:
        xc = x_ref[0]
    acc = jnp.dot(w_ref[...], xc, preferred_element_type=jnp.float32)
    o_ref[0] = (acc + b_ref[...]).astype(o_ref.dtype)


def causal_conv_transpose_1d(x, weight, bias, stride, *,
                             max_time_tile=None, target_step_bytes=3 << 20):
    """x: (N, C_in, L); weight: (C_in, C_out, K) (PyTorch ConvTranspose1d layout);
    bias: (C_out,).  Returns ConvTranspose1d(x)[..., : L*stride] of shape (N, C_out, L*stride)."""
    N, C_in, L = x.shape
    w_cin, C_out, K = weight.shape
    assert w_cin == C_in
    S = int(stride)
    Q = _cdiv(K, S)                       # taps per output residue
    assert Q - 1 <= LANE, "kernel_size too large for a single 128-lane halo"
    HALO = LANE                           # causal halo carried from the previous tile

    in_it = jnp.dtype(x.dtype).itemsize
    out_it = in_it

    # ---- generation-aware VMEM budget & time-tile sizing ---------------------
    phys_vmem = _vmem_capacity_bytes()
    vmem_budget = min(int(phys_vmem * 0.70), 100 << 20)

    # persistent VMEM that does not scale with TL
    fixed = (2 * C_in * HALO * in_it                                  # halo blocks x2
             + 2 * (S * C_out * Q * C_in * in_it + S * C_out * 4)     # weights + bias
             + C_in * HALO * in_it                                    # ext scratch halo part
             + (2 << 20))                                             # headroom
    # VMEM bytes per time lane (double-buffered tiles + scratch + transients)
    per_lane = (2 * C_in * in_it            # input tile x2
                + 2 * S * C_out * out_it    # output tile x2
                + C_in * in_it              # ext scratch
                + 2 * Q * C_in * in_it      # xc scratch + transient
                + 2 * S * C_out * 4)        # f32 accumulator + epilogue
    tl_cap = max(HALO, (max(vmem_budget - fixed, 0) // per_lane) // LANE * LANE)

    # aim for a few MiB of HBM traffic per grid step (amortize ~0.35us step cost)
    hbm_per_lane = C_in * in_it + S * C_out * out_it
    tl = max(LANE, _round_up(max(target_step_bytes // hbm_per_lane, 1), LANE))
    if max_time_tile is not None:
        tl = min(tl, max(LANE, _round_up(int(max_time_tile), LANE)))
    tl = max(HALO, min(tl, tl_cap))

    # derive tile count from L (avoid huge zero tails) and keep >= 2 grid steps
    # when possible so both TensorCores get work on dual-TC chips (v7x).
    n_tiles = _cdiv(L, tl)
    if N * n_tiles < 2 and L > LANE:
        n_tiles = 2
    tl = min(tl, _round_up(_cdiv(L, n_tiles), HALO))
    tl = max(tl, HALO)
    n_tiles = _cdiv(L, tl)
    L_pad = n_tiles * tl

    # ---- wrapper-side layout glue (single cheap pass) ------------------------
    x_p = x if L_pad == L else jnp.pad(x, ((0, 0), (0, 0), (0, L_pad - L)))

    # W'[(r*C_out+co), (q*C_in+ci)] = w[ci, co, q*S + r]   (zero for q*S+r >= K)
    w_full = jnp.pad(weight, ((0, 0), (0, 0), (0, Q * S - K)))
    w_fused = jnp.transpose(w_full.reshape(C_in, C_out, Q, S), (3, 1, 2, 0))
    w_fused = w_fused.reshape(S * C_out, Q * C_in).astype(x.dtype)
    # bias kept f32 so the add happens on the f32 accumulator
    b_fused = jnp.tile(bias.astype(jnp.float32), S).reshape(S * C_out, 1)

    ratio = tl // HALO
    kernel = functools.partial(_fused_kernel, q_taps=Q, c_in=C_in, tl=tl, halo=HALO)

    need = fixed + per_lane * tl
    vmem_limit = int(min(int(phys_vmem * 0.9), max(16 << 20, 2 * need)))

    out_cols = pl.pallas_call(
        kernel,
        out_shape=jax.ShapeDtypeStruct((N, S * C_out, L_pad), x.dtype),
        grid=(N, n_tiles),
        in_specs=[
            # current time tile
            pl.BlockSpec((1, C_in, tl), lambda n, t: (n, 0, t)),
            # 128-lane halo = tail of the previous tile (clamped at t=0; zeroed in-kernel)
            pl.BlockSpec((1, C_in, HALO),
                         lambda n, t: (n, 0, jnp.maximum(t * ratio - 1, 0))),
            # fused weights / bias, resident across the grid
            pl.BlockSpec((S * C_out, Q * C_in), lambda n, t: (0, 0)),
            pl.BlockSpec((S * C_out, 1), lambda n, t: (0, 0)),
        ],
        out_specs=pl.BlockSpec((1, S * C_out, tl), lambda n, t: (n, 0, t)),
        scratch_shapes=[
            pltpu.VMEM((C_in, HALO + tl), x.dtype),
            pltpu.VMEM((Q * C_in, tl), x.dtype),
        ],
        compiler_params=pltpu.CompilerParams(
            dimension_semantics=("parallel", "parallel"),
            vmem_limit_bytes=vmem_limit),
    )(x_p, x_p, w_fused, b_fused)

    # De-interleave residues: out_cols[n, r*C_out+co, m] == out[n, co, m*S + r].
    # TODO(synk): fold this stride-S lane interleave into the kernel store once a
    # reliable Mosaic lowering for lane-granularity shuffles is available.
    out = out_cols[:, :, :L].reshape(N, S, C_out, L)
    out = jnp.transpose(out, (0, 2, 3, 1)).reshape(N, C_out, L * S)
    return out


def _reference(x, weight, bias, stride):
    """Pure-JAX reference of ConvTranspose1d + causal crop (PyTorch semantics)."""
    N, C_in, L = x.shape
    _, C_out, K = weight.shape
    L_full = (L - 1) * stride + K
    contrib = jnp.einsum('ncl,cok->nokl',
                         x.astype(jnp.float32), weight.astype(jnp.float32))
    y = jnp.zeros((N, C_out, L_full), jnp.float32)
    for k in range(K):
        y = y.at[:, :, k: k + (L - 1) * stride + 1: stride].add(contrib[:, :, k, :])
    y = y + bias.astype(jnp.float32)[None, :, None]
    return y[:, :, : L * stride]


if __name__ == "__main__":
    def _run_case(tag, N, C_in, C_out, K, stride, L, dtype, tol, **kw):
        key = jax.random.fold_in(jax.random.PRNGKey(0), tag)
        kx, kwt, kb = jax.random.split(key, 3)
        x = jax.random.normal(kx, (N, C_in, L), dtype=jnp.float32)
        weight = jax.random.normal(kwt, (C_in, C_out, K), dtype=jnp.float32) * 0.1
        bias = jax.random.normal(kb, (C_out,), dtype=jnp.float32) * 0.1

        out = causal_conv_transpose_1d(
            x.astype(dtype), weight.astype(dtype), bias, stride, **kw)
        out = jax.block_until_ready(out)

        ref = _reference(x, weight, bias, stride)
        assert out.shape == (N, C_out, L * stride), out.shape
        err = float(jnp.max(jnp.abs(out.astype(jnp.float32) - ref)))
        assert jnp.allclose(out.astype(jnp.float32), ref, atol=tol, rtol=tol), (tag, err)

    # Module config: CausalConvTranspose1d(in_channels=4, out_channels=8, kernel_size=4, stride=2)
    _run_case(0, 2, 4, 8, 4, 2, 16, jnp.float32, 1e-4)
    # Multi time tile with halo carry (forced small tile), non-multiple-of-128 L, Q=3 taps.
    _run_case(1, 1, 4, 8, 7, 3, 300, jnp.float32, 1e-4, max_time_tile=128)
    # kernel_size <= stride (Q == 1, no halo path).
    _run_case(2, 2, 4, 8, 2, 2, 40, jnp.float32, 1e-4)
    # bf16 activations/weights, multi tile.
    _run_case(3, 2, 4, 8, 4, 2, 200, jnp.bfloat16, 3e-2, max_time_tile=128)

    print("KERNEL_OK")
</pallas_src>

<mosaic_0001>
module attributes {stable_mosaic.version = 11 : i64} {
  func.func @_fused_kernel(%arg0: i32, %arg1: i32, %arg2: memref<1x4x128xf32, #tpu.memory_space<vmem>>, %arg3: memref<1x4x128xf32, #tpu.memory_space<vmem>>, %arg4: memref<16x8xf32, #tpu.memory_space<vmem>>, %arg5: memref<16x1xf32, #tpu.memory_space<vmem>>, %arg6: memref<1x16x128xf32, #tpu.memory_space<vmem>>, %arg7: memref<4x256xf32, #tpu.memory_space<vmem>>, %arg8: memref<8x128xf32, #tpu.memory_space<vmem>>) attributes {dimension_semantics = [#tpu.dimension_semantics<parallel>, #tpu.dimension_semantics<parallel>], iteration_bounds = array<i64: 2, 1>, scalar_prefetch = 0 : i64, scratch_operands = 2 : i64, tpu.core_type = #tpu.core_type<tc>, window_params = [{transform_indices = @transform_0, window_bounds = array<i64: 1, 4, 128>}, {transform_indices = @transform_1, window_bounds = array<i64: 1, 4, 128>}, {pipeline_mode = #tpu.pipeline_mode<synchronous>, transform_indices = @transform_2, window_bounds = array<i64: 16, 8>}, {pipeline_mode = #tpu.pipeline_mode<synchronous>, transform_indices = @transform_3, window_bounds = array<i64: 16, 1>}, {transform_indices = @transform_4, window_bounds = array<i64: 1, 16, 128>}]} {
    %c0 = arith.constant 0 : index
    %c0_0 = arith.constant 0 : index
    %c0_1 = arith.constant 0 : index
    %0 = vector.load %arg3[%c0, %c0_0, %c0_1] : memref<1x4x128xf32, #tpu.memory_space<vmem>>, vector<1x4x128xf32>
    %1 = vector.shape_cast %0 : vector<1x4x128xf32> to vector<4x128xf32>
    %c0_i32 = arith.constant 0 : i32
    %2 = arith.cmpi sgt, %arg1, %c0_i32 : i32
    %cst = arith.constant 0.000000e+00 : f32
    %3 = vector.broadcast %cst : f32 to vector<4x128xf32>
    %4 = arith.select %2, %1, %3 : vector<4x128xf32>
    %c0_2 = arith.constant 0 : index
    %c0_3 = arith.constant 0 : index
    %5 = vector.load %arg7[%c0_2, %c0_3] : memref<4x256xf32, #tpu.memory_space<vmem>>, vector<4x128xf32>
    tpu.vector_store %arg7[%c0_2, %c0_3], %4 {strides = array<i32>} : memref<4x256xf32, #tpu.memory_space<vmem>>, vector<4x128xf32>,
    %c0_4 = arith.constant 0 : index
    %c0_5 = arith.constant 0 : index
    %c0_6 = arith.constant 0 : index
    %6 = vector.load %arg2[%c0_4, %c0_5, %c0_6] : memref<1x4x128xf32, #tpu.memory_space<vmem>>, vector<1x4x128xf32>
    %7 = vector.shape_cast %6 : vector<1x4x128xf32> to vector<4x128xf32>
    %c0_7 = arith.constant 0 : index
    %c128 = arith.constant 128 : index
    %8 = vector.load %arg7[%c0_7, %c128] : memref<4x256xf32, #tpu.memory_space<vmem>>, vector<4x128xf32>
    tpu.vector_store %arg7[%c0_7, %c128], %7 {strides = array<i32>} : memref<4x256xf32, #tpu.memory_space<vmem>>, vector<4x128xf32>,
    %c0_8 = arith.constant 0 : index
    %c128_9 = arith.constant 128 : index
    %9 = vector.load %arg7[%c0_8, %c128_9] : memref<4x256xf32, #tpu.memory_space<vmem>>, vector<4x128xf32>
    %c0_10 = arith.constant 0 : index
    %c0_11 = arith.constant 0 : index
    %10 = vector.load %arg8[%c0_10, %c0_11] : memref<8x128xf32, #tpu.memory_space<vmem>>, vector<4x128xf32>
    tpu.vector_store %arg8[%c0_10, %c0_11], %9 {strides = array<i32>} : memref<8x128xf32, #tpu.memory_space<vmem>>, vector<4x128xf32>,
    %c0_12 = arith.constant 0 : index
    %c127 = arith.constant 127 : index
    %11 = vector.load %arg7[%c0_12, %c127] : memref<4x256xf32, #tpu.memory_space<vmem>>, vector<4x128xf32>
    %c4 = arith.constant 4 : index
    %c0_13 = arith.constant 0 : index
    %12 = vector.load %arg8[%c4, %c0_13] : memref<8x128xf32, #tpu.memory_space<vmem>>, vector<4x128xf32>
    tpu.vector_store %arg8[%c4, %c0_13], %11 {strides = array<i32>} : memref<8x128xf32, #tpu.memory_space<vmem>>, vector<4x128xf32>,
    %c0_14 = arith.constant 0 : index
    %c0_15 = arith.constant 0 : index
    %13 = vector.load %arg8[%c0_14, %c0_15] : memref<8x128xf32, #tpu.memory_space<vmem>>, vector<8x128xf32>
    %c0_16 = arith.constant 0 : index
    %c0_17 = arith.constant 0 : index
    %14 = vector.load %arg4[%c0_16, %c0_17] : memref<16x8xf32, #tpu.memory_space<vmem>>, vector<16x8xf32>
    %cst_18 = arith.constant dense<0.000000e+00> : vector<16x128xf32>
    %15 = tpu.matmul %14, %13, %cst_18 {dimension_numbers = #tpu.dot_dimension_numbers<[1], [0], [0], [1], [0, 0, 1, 1], [], []>} : vector<16x8xf32>, vector<8x128xf32>, vector<16x128xf32> -> vector<16x128xf32>
    %c0_19 = arith.constant 0 : index
    %c0_20 = arith.constant 0 : index
    %16 = vector.load %arg5[%c0_19, %c0_20] : memref<16x1xf32, #tpu.memory_space<vmem>>, vector<16x1xf32>
    %17 = vector.broadcast %16 : vector<16x1xf32> to vector<16x128xf32>
    %18 = arith.addf %15, %17 : vector<16x128xf32>
    %c0_21 = arith.constant 0 : index
    %c0_22 = arith.constant 0 : index
    %c0_23 = arith.constant 0 : index
    %19 = vector.load %arg6[%c0_21, %c0_22, %c0_23] : memref<1x16x128xf32, #tpu.memory_space<vmem>>, vector<1x16x128xf32>
    %20 = vector.shape_cast %19 : vector<1x16x128xf32> to vector<16x128xf32>
    %21 = vector.shape_cast %18 : vector<16x128xf32> to vector<1x16x128xf32>
    tpu.vector_store %arg6[%c0_21, %c0_22, %c0_23], %21 {strides = array<i32>} : memref<1x16x128xf32, #tpu.memory_space<vmem>>, vector<1x16x128xf32>,
    return
  }
  func.func @transform_0(%arg0: i32, %arg1: i32) -> (i32, i32, i32) {
    %c0_i32 = arith.constant 0 : i32
    %c0_i32_0 = arith.constant 0 : i32
    return %arg0, %c0_i32, %arg1 : i32, i32, i32
  }
  func.func @transform_1(%arg0: i32, %arg1: i32) -> (i32, i32, i32) {
    %c1_i32 = arith.constant 1 : i32
    %0 = arith.muli %arg1, %c1_i32 : i32
    %c1_i32_0 = arith.constant 1 : i32
    %1 = arith.subi %0, %c1_i32_0 : i32
    %c0_i32 = arith.constant 0 : i32
    %2 = arith.maxsi %1, %c0_i32 : i32
    %c0_i32_1 = arith.constant 0 : i32
    %c0_i32_2 = arith.constant 0 : i32
    return %arg0, %c0_i32_1, %2 : i32, i32, i32
  }
  func.func @transform_2(%arg0: i32, %arg1: i32) -> (i32, i32) {
    %c0_i32 = arith.constant 0 : i32
    %c0_i32_0 = arith.constant 0 : i32
    %c0_i32_1 = arith.constant 0 : i32
    return %c0_i32, %c0_i32_0 : i32, i32
  }
  func.func @transform_3(%arg0: i32, %arg1: i32) -> (i32, i32) {
    %c0_i32 = arith.constant 0 : i32
    %c0_i32_0 = arith.constant 0 : i32
    %c0_i32_1 = arith.constant 0 : i32
    return %c0_i32, %c0_i32_0 : i32, i32
  }
  func.func @transform_4(%arg0: i32, %arg1: i32) -> (i32, i32, i32) {
    %c0_i32 = arith.constant 0 : i32
    %c0_i32_0 = arith.constant 0 : i32
    return %arg0, %c0_i32, %arg1 : i32, i32, i32
  }
}

</mosaic_0001>

<bundles_post_ra>
// kernel: tpu_custom_call.1
= control target key start
LH: loop header
LB: loop body
LE: loop exit
PB: predicated region body
PF: predicated region fallthrough
CT: control target
= control target key end

     0   :  { %9 = vsyncpa [#allocation5], 0  ;;  %s820_s0 = inlined_call_operand.vmem [shape: f32[2,4,128], index: 0, kind: input, shape index: {}]   ;;  %s821_s1 = inlined_call_operand.vmem [shape: f32[2,4,128], index: 1, kind: input, shape index: {}]   ;;  %s822_s2 = inlined_call_operand.vmem [shape: f32[16,8], index: 2, kind: input, shape index: {}]   ;;  %s823_s3 = inlined_call_operand.vmem [shape: f32[16,1], index: 3, kind: input, shape index: {}]   ;;  %s824_s4 = inlined_call_operand.hbm [shape: f32[2,16,128], index: 4, kind: output, shape index: {}]  }
   0x1   :  { %11 = vsyncpa [#allocation5 + $0x1], 0  ;;  %s691_s15 = smov 0   ;;  %s693_s16 = smov 0  }
   0x2   :  { %s695_s17 = smov 0   ;;  %s697_s18 = smov 0  }
   0x3   :  { %s699_s1 = smov 0   ;;  %s701_s19 = smov 0  }
   0x4 LB: > { %s493_s20 = sadd.s32 4294967295, %s658_s19   ;;  %s494_s21 = sadd.s32 4294967294, %s658_s19   ;;  %s658_s19 = sphi %s701_s19, %s17_s19   ;;  %s654_s1 = sphi %s699_s1, %s831_s1   ;;  %s650_s18 = sphi %s697_s18, %s830_s18   ;;  %s646_s17 = sphi %s695_s17, %s829_s17   ;;  %s642_s16 = sphi %s693_s16, %s828_s16   ;;  %s638_s15 = sphi %s691_s15, %s827_s15  }
   0x5   : > { %s29_s22 = sadd.s32 1, %s654_s1  ;;  %s142_s23 = sadd.s32 1, %s646_s17 }
   0x6   : > { %p31_p0 = scmp.ge.s32.totalorder %s29_s22, 2  ;;  %p152_p1 = scmp.ne.s32.totalorder %s646_s17, %s642_s16 }
   0x7   : > { %p153_p2 = scmp.eq.s32.totalorder %s493_s20, 1  ;;  %p158_p3 = scmp.ne.s32.totalorder %s642_s16, %s638_s15 }
   0x8   : > { %s833_s22 = smov (%p31_p0, %s29_s22), 0  ;;  %p159_p5 = scmp.eq.s32.totalorder %s494_s21, 1 }
   0x9   : > { %p731_p4 = por %p153_p2, %p152_p1  ;;  %s137_s25 = ssub.s32 %s654_s1, %s833_s22 }
   0xa   : > { %p497_p6 = scmp.ge.s32.totalorder %s658_s19, 1  ;;  %p140_p7 = scmp.eq.s32.totalorder %s137_s25, 0 }
   0xb   : > { %p738_p8 = por %p159_p5, %p158_p3  ;;  %p209_p9 = scmp.lt.s32.totalorder %s658_s19, 3 }
   0xc   : > { %s744_s27 = scalar_select %p140_p7, %s646_s17, %s142_s23  }
   0xd   : > { %p210_p10 = pnand %p497_p6, %p209_p9 }
   0xe   : > { %p247_p11 = scmp.lt.s32.totalorder (!%p210_p10), %s650_s18, 1  ;;  %v660_v0 = vmov (!%p210_p10), 0.0   ;;  %s661_s7 = smov (!%p210_p10), 1   ;;  %v290_v5 = vld [vmem:[%s822_s2] sm:$0xff] (!%p210_p10)  ;;  %vm304_vm0 = vcmask (!%p210_p10), 64512   ;;  %v662_v7 = vmov (!%p210_p10), 0  }
   0xf   : > { %213 = sbr.rel (%p210_p10) target bundleno = 395 (0x18b), region = 36  ;;  %273 = vst [vmem:[#allocation2] sm:$0xf] (!%p210_p10), %v660_v0  ;;  %514 = vmatprep.mubr.msk.f32.mxu0 (!%p210_p10), %vm304_vm0, %v290_v5  ;;  %v292_v6 = vld [vmem:[%s823_s3] sm:$0xff] (!%p210_p10)  ;;  %577 = vset.pattern.permute.xlu1 (!%p210_p10), %v662_v7  ;;  %v293_v8 = vld [vmem:[%s823_s3 + $0x8] sm:$0xff] (!%p210_p10)  ;;  %vm285_vm1 = vcmask (!%p210_p10), 7168  }
  0x10   : > { %578 = vset.pattern.permute.xlu0 (!%p210_p10), %v662_v7  ;;  %296 = vperm.xlu1 (!%p210_p10), %577, %v292_v6   ;;  %v291_v13 = vld [vmem:[%s822_s2 + $0x8] sm:$0xff] (!%p210_p10)  ;;  %s244_s21 = sand.u32 (!%p210_p10), 1, %s642_s16   ;;  %s663_s8 = smov (!%p210_p10), [#allocation4]  }
  0x11   : > { %s498_s23 = sshll.u32 (!%p210_p10), %s244_s21, 4  ;;  %s584_s9 = sshll.u32 (!%p210_p10), %s663_s8, 4  ;;  %s585_s9 = int_to_ptr.vmem [resolvable:$false] %s584_s9 }
  0x12   : > { %s246_s25 = scalar_lea.vmem (!%p210_p10), [#allocation4], %s498_s23  ;;  %s586_s10 = scalar_lea.vmem (!%p210_p10), %s585_s9, 512 }
  0x14   : > { %301 = vperm.xlu1 (!%p210_p10), %577, %v293_v8  }
  0x16   : > { %s248_s28 = scalar_select %p247_p11, %s650_s18, 1 }
  0x18   : > { %s499_s29 = sshll.u32 %s248_s28, 2  ;;  %s403_s28 = sshll.u32 %s246_s25, 4  ;;  %s767_s28 = int_to_ptr.vmem [resolvable:$true] %s403_s28 }
  0x19   : > { %s253_s6 = scalar_lea.vmem %s820_s0, %s499_s29  ;;  %s508_s29 = sshll.u32 %s650_s18, 8 }
  0x1a   : > { %v274_v1 = vld [vmem:[%s253_s6] sm:$0xf]  ;;  %s772_s6 = scalar_lea.hbm %s824_s4, %s508_s29  ;;  %s580_s18 = scalar_lea.vmem %s767_s28, 256 }
  0x1b   : > { %275 = vst [vmem:[#allocation2 + $0x4] sm:$0xf] %v274_v1  ;;  %p581_p12 = scmp.ne.s32.totalorder %s767_s28, %s580_s18  ;;  %p587_p1 = scmp.lt.s32.totalorder %s767_s28, %s585_s9 }
  0x1c   : > { %p588_p2 = scmp.lt.s32.totalorder %s586_s10, %s580_s18 }
  0x1d   : > { %p582_p13 = pnand %p581_p12, %p731_p4 }
  0x1e   : > { %p589_p3 = por %p588_p2, %p587_p1 }
  0x1f   : > { %p583_p0 = pneg %p582_p13 }
  0x21   : > { %p590_p5 = pnand %p589_p3, %p583_p0 }
  0x22   : > { %v278_v2 = vld [vmem:[#allocation2] sm:$0xff] }
  0x23   : > { %v276_v3 = vld [vmem:[#allocation2 + $0x4] sm:$0xf]  ;;  %281 = vrot.lane.b32.xlu0 %v278_v2, %s661_s7  ;;  %v280_v4 = vcombine.high %v278_v2, %v278_v2 }
  0x24   : > { %277 = vst [vmem:[#allocation3] sm:$0xf] %v276_v3 }
  0x27   : > { %283 = vrot.lane.b32.xlu0 %v280_v4, %s661_s7  ;;  %s774_s7 = scalar_lea.sflag [#allocation5], %s244_s21 }
  0x8f   : > { %v297_v14 = vpop.permute.xlu1 %296 }
  0x93   : > { %v302_v15 = vpop.permute.xlu1 %301 }
  0x95   : > { %v282_v9 = vpop.permute.xlu0 %281 }
  0x99   : > { %v284_v10 = vpop.permute.xlu0 %283 }
  0x9a   : > { %v286_v11 = vsel %vm285_vm1, %v282_v9, %v284_v10 }
  0x9b   : > { %288 = vst [vmem:[#allocation3 + $0x4] sm:$0xf] %v286_v11 }
  0xa2   : > { %v289_v12 = vld [vmem:[#allocation3] sm:$0xff] }
  0xa3   : > { %512 = vmatprep.subr.mxu0 %v289_v12 }
  0xa4   : > { %513 = vmatpush3.msra.mxu0 %v289_v12 }
  0xa5   : > { %515 = vmatmul.mubr.msk.f32.vlgmr.msra.gmra.mrb[0].mxu0 %vm304_vm0, %v291_v13 }
 0x178   : > { %v516_v16 = vpop.f32.mrb[0].mxu0 }
 0x179   : > { %v383_v17 = vadd.f32 %v516_v16, %v302_v15  ;;  %v377_v18 = vpop.f32.mrb[1].mxu0 }
 0x17a   : > { %v378_v19 = vadd.f32 %v377_v18, %v297_v14 }
 0x17b   : > { %387 = vst [vmem:[%s246_s25 + $0x8] sm:$0xff] %v383_v17 }
 0x17c   : > { %386 = vst [vmem:[%s246_s25] sm:$0xff] %v378_v19 }
 0x17d   : > { %593 = shalt.err (!%p590_p5)
}
 0x17e   : > { %s594_s11 = scalar_lea.hbm %s772_s6, 256  ;;  %s598_s14 = scalar_lea.hbm %s824_s4, 512 }
 0x17f   : > { %p595_p6 = scmp.ne.s32.totalorder %s772_s6, %s594_s11  ;;  %p599_p10 = scmp.lt.u32.totalorder %s772_s6, %s824_s4 }
 0x180   : > { %p600_p11 = scmp.lt.u32.totalorder %s598_s14, %s594_s11  ;;  %p602_p13 = scmp.lt.u32.totalorder %s594_s11, %s772_s6 }
 0x181   : > { %p596_p7 = pnand %p595_p6, %p731_p4 }
 0x182   : > { %p601_p12 = por %p600_p11, %p599_p10 }
 0x183   : > { %p597_p9 = pneg %p596_p7 }
 0x184   : > { %p603_p0 = por %p602_p13, %p601_p12 }
 0x186   : > { %p604_p1 = pnand %p603_p0, %p597_p9 }
 0x188   : > { %607 = shalt.err (!%p604_p1)
}
 0x189   : > { %s664_s23 = smov 128   ;;  %s665_s25 = smov 8  }
 0x18a   : > { %517 = dma.vmem_to_hbm [thread:$0]  (%p731_p4), %s767_s28, 256, %s772_s6, %s774_s7, %s664_s23, %s664_s23, %s665_s25  }
 0x18b PF: > { %p523_p2 = scmp.ge.s32.totalorder %s658_s19, 2  ;;  %s418_s29 = sand.u32 1, %s638_s15  }
 0x18c   : > { %s419_s30 = scalar_lea.sflag [#allocation5], %s418_s29 }
 0x18d   : > { %p520_p3 = pnand %p523_p2, %p738_p8 }
 0x18f   : > { %633 = dma.done.wait (!%p520_p3), %s419_s30, 256  }
 0x190   : > { %635 = vsyncadd (!%p520_p3), %s419_s30, 4294967040  ;;  %s17_s19 = sadd.s32 1, %s658_s19   ;;  %s827_s15 = smov %s642_s16 }
 0x191   : > { %p14_p5 = scmp.ge.s32.totalorder %s17_s19, 4   ;;  %s828_s16 = smov %s646_s17 }
 0x192   : > { %s829_s17 = smov %s744_s27  ;;  %s830_s18 = smov %s654_s1 }
 0x193   : > { %s831_s1 = smov %s833_s22  ;;  %16 = sbr.rel (!%p14_p5) target bundleno = 4 (0x4), region = 74 }
 0x19a   :  { %424 = vsyncpa [#allocation5], 1 }
 0x19b   :  { %426 = vsyncpa [#allocation5 + $0x1], 1 }

</bundles_post_ra>
